<compile_context>
chip_gen: v7x
topology: tpu7x:2x2x1
jax: 0.10.0
libtpu: 0.0.40
codegen_flags: <defaults>
</compile_context>

<pallas_src>
import jax
import jax.numpy as jnp
from jax.experimental import pallas as pl
from jax.experimental.pallas import tpu as pltpu


def _round_up(n, m):
    return ((n + m - 1) // m) * m


def ensemble_kernel(x_ref, wa_ref, ba_ref, wb_ref, bb_ref, out_ref, acc_ref):
    """Grid = (batch_tiles [parallel], k_tiles [arbitrary])."""
    k = pl.program_id(1)

    @pl.when(k == 0)
    def _():
        acc_ref[...] = jnp.zeros_like(acc_ref)

    # modelA partial matmul: bf16 operands on the MXU, f32 accumulation.
    acc_ref[...] += jnp.dot(
        x_ref[...], wa_ref[...], preferred_element_type=jnp.float32
    )

    @pl.when(k == pl.num_programs(1) - 1)
    def _():
        # Bias + ReLU in f32 on the VPU (v5e-friendly), then the head matmul
        # in bf16 on the MXU with f32 accumulation.
        h = jnp.maximum(acc_ref[...] + ba_ref[...], 0.0)
        y = jnp.dot(h.astype(jnp.bfloat16), wb_ref[...],
                    preferred_element_type=jnp.float32)
        out_ref[...] = (y + bb_ref[...]).astype(out_ref.dtype)


def my_ensemble_forward(x_nchw, wa, ba, wb, bb):
    """x_nchw: [B, C, H, W] float32. wa: [d_in, hidden], wb: [hidden, classes].
    Returns [B, num_classes] float32."""
    B = x_nchw.shape[0]
    d_in = x_nchw.shape[1] * x_nchw.shape[2] * x_nchw.shape[3]
    hidden = wa.shape[1]
    num_classes = wb.shape[1]

    # Lane/sublane-friendly padded sizes.
    d_in_p = _round_up(d_in, 128)
    hid_p = _round_up(hidden, 128)          # lane-dense hidden
    cls_p = _round_up(num_classes, 128)     # lane-dense output (unmasked vst)

    # Batch tile: at least 8 sublanes, up to 256 rows/block (fills MXU rows).
    tile_b = min(256, _round_up(B, 8))
    b_p = _round_up(B, tile_b)

    # K tile: largest of {1024, 512, 256, 128} that divides padded d_in.
    tile_k = 128
    for cand in (1024, 512, 256):
        if d_in_p % cand == 0:
            tile_k = cand
            break

    # Flatten + pad; MXU operands stored as bf16 (halves HBM traffic),
    # biases kept f32 for the elementwise path.
    x2d = x_nchw.reshape(B, d_in).astype(jnp.bfloat16)
    x2d = jnp.pad(x2d, ((0, b_p - B), (0, d_in_p - d_in)))
    wa_p = jnp.pad(wa.astype(jnp.bfloat16),
                   ((0, d_in_p - d_in), (0, hid_p - hidden)))
    wb_p = jnp.pad(wb.astype(jnp.bfloat16),
                   ((0, hid_p - hidden), (0, cls_p - num_classes)))
    ba_p = jnp.pad(ba.astype(jnp.float32), (0, hid_p - hidden)).reshape(1, hid_p)
    bb_p = jnp.pad(bb.astype(jnp.float32),
                   (0, cls_p - num_classes)).reshape(1, cls_p)

    grid = (b_p // tile_b, d_in_p // tile_k)

    flops = 2 * b_p * d_in_p * hid_p + 2 * b_p * hid_p * cls_p
    bytes_accessed = (x2d.size * 2 + wa_p.size * 2 + wb_p.size * 2
                      + ba_p.size * 4 + bb_p.size * 4 + b_p * cls_p * 4)

    out = pl.pallas_call(
        ensemble_kernel,
        out_shape=jax.ShapeDtypeStruct((b_p, cls_p), jnp.float32),
        grid_spec=pltpu.PrefetchScalarGridSpec(
            num_scalar_prefetch=0,
            grid=grid,
            in_specs=[
                pl.BlockSpec((tile_b, tile_k), lambda i, k: (i, k)),   # x
                pl.BlockSpec((tile_k, hid_p), lambda i, k: (k, 0)),    # wa
                pl.BlockSpec((1, hid_p), lambda i, k: (0, 0)),         # ba
                pl.BlockSpec((hid_p, cls_p), lambda i, k: (0, 0)),     # wb
                pl.BlockSpec((1, cls_p), lambda i, k: (0, 0)),         # bb
            ],
            out_specs=pl.BlockSpec((tile_b, cls_p), lambda i, k: (i, 0)),
            scratch_shapes=[pltpu.VMEM((tile_b, hid_p), jnp.float32)],
        ),
        compiler_params=pltpu.CompilerParams(
            dimension_semantics=("parallel", "arbitrary"),
            vmem_limit_bytes=64 * 1024 * 1024,
        ),
        cost_estimate=pl.CostEstimate(
            flops=flops, transcendentals=0, bytes_accessed=bytes_accessed),
    )(x2d, wa_p, ba_p, wb_p, bb_p)

    # Slice off batch / class padding.
    return out[:B, :num_classes]


if __name__ == "__main__":
    # Small deterministic shapes consistent with the module's forward:
    # NCHW image input -> modelA (backbone) -> modelB (head).
    B, C, H, W = 2, 4, 16, 16
    hidden, num_classes = 32, 10
    d_in = C * H * W

    key = jax.random.PRNGKey(0)
    kx, kwa, kba, kwb, kbb = jax.random.split(key, 5)

    x = jax.random.normal(kx, (B, C, H, W), dtype=jnp.float32)
    # Deterministic synthetic parameters (not a checkpoint load).
    wa = jax.random.normal(kwa, (d_in, hidden), dtype=jnp.float32) * 0.02
    ba = jax.random.normal(kba, (hidden,), dtype=jnp.float32) * 0.02
    wb = jax.random.normal(kwb, (hidden, num_classes), dtype=jnp.float32) * 0.02
    bb = jax.random.normal(kbb, (num_classes,), dtype=jnp.float32) * 0.02

    out = my_ensemble_forward(x, wa, ba, wb, bb)
    jax.block_until_ready(out)

    # Pure-JAX f32 reference of the same ensemble composition.
    # Tolerance relaxed because the kernel uses bf16 MXU operands (f32 accum).
    ref = jnp.maximum(x.reshape(B, d_in) @ wa + ba, 0.0) @ wb + bb
    assert out.shape == (B, num_classes)
    assert jnp.allclose(out, ref, atol=1e-2, rtol=5e-2), (
        f"max abs err {jnp.max(jnp.abs(out - ref))}")

    print("KERNEL_OK")
</pallas_src>

<mosaic_0001>
module attributes {stable_mosaic.version = 11 : i64} {
  func.func @ensemble_kernel(%arg0: i32, %arg1: i32, %arg2: memref<8x1024xbf16, #tpu.memory_space<vmem>>, %arg3: memref<1024x128xbf16, #tpu.memory_space<vmem>>, %arg4: memref<1x128xf32, #tpu.memory_space<vmem>>, %arg5: memref<128x128xbf16, #tpu.memory_space<vmem>>, %arg6: memref<1x128xf32, #tpu.memory_space<vmem>>, %arg7: memref<8x128xf32, #tpu.memory_space<vmem>>, %arg8: memref<8x128xf32, #tpu.memory_space<vmem>>) attributes {dimension_semantics = [#tpu.dimension_semantics<parallel>, #tpu.dimension_semantics<arbitrary>], iteration_bounds = array<i64: 1, 1>, scalar_prefetch = 0 : i64, scratch_operands = 1 : i64, tpu.core_type = #tpu.core_type<tc>, window_params = [{transform_indices = @transform_0, window_bounds = array<i64: 8, 1024>}, {transform_indices = @transform_1, window_bounds = array<i64: 1024, 128>}, {pipeline_mode = #tpu.pipeline_mode<synchronous>, transform_indices = @transform_2, window_bounds = array<i64: 1, 128>}, {pipeline_mode = #tpu.pipeline_mode<synchronous>, transform_indices = @transform_3, window_bounds = array<i64: 128, 128>}, {pipeline_mode = #tpu.pipeline_mode<synchronous>, transform_indices = @transform_4, window_bounds = array<i64: 1, 128>}, {transform_indices = @transform_5, window_bounds = array<i64: 8, 128>}]} {
    %c0_i32 = arith.constant 0 : i32
    %0 = arith.cmpi eq, %arg1, %c0_i32 : i32
    %1 = arith.extui %0 : i1 to i32
    %c0_i32_0 = arith.constant 0 : i32
    %2 = arith.cmpi ne, %1, %c0_i32_0 : i32
    scf.if %2 {
      %cst_10 = arith.constant 0.000000e+00 : f32
      %12 = vector.broadcast %cst_10 : f32 to vector<8x128xf32>
      %c0_11 = arith.constant 0 : index
      %c0_12 = arith.constant 0 : index
      %13 = vector.load %arg8[%c0_11, %c0_12] : memref<8x128xf32, #tpu.memory_space<vmem>>, vector<8x128xf32>
      tpu.vector_store %arg8[%c0_11, %c0_12], %12 {strides = array<i32>} : memref<8x128xf32, #tpu.memory_space<vmem>>, vector<8x128xf32>,
    } else {
    }
    %c0 = arith.constant 0 : index
    %c0_1 = arith.constant 0 : index
    %3 = vector.load %arg8[%c0, %c0_1] : memref<8x128xf32, #tpu.memory_space<vmem>>, vector<8x128xf32>
    %c0_2 = arith.constant 0 : index
    %c0_3 = arith.constant 0 : index
    %4 = vector.load %arg2[%c0_2, %c0_3] : memref<8x1024xbf16, #tpu.memory_space<vmem>>, vector<8x1024xbf16>
    %c0_4 = arith.constant 0 : index
    %c0_5 = arith.constant 0 : index
    %5 = vector.load %arg3[%c0_4, %c0_5] : memref<1024x128xbf16, #tpu.memory_space<vmem>>, vector<1024x128xbf16>
    %cst = arith.constant dense<0.000000e+00> : vector<8x128xf32>
    %6 = tpu.matmul %4, %5, %cst {dimension_numbers = #tpu.dot_dimension_numbers<[1], [0], [0], [1], [0, 0, 1, 1], [], []>} : vector<8x1024xbf16>, vector<1024x128xbf16>, vector<8x128xf32> -> vector<8x128xf32>
    %7 = arith.addf %3, %6 : vector<8x128xf32>
    %c0_6 = arith.constant 0 : index
    %c0_7 = arith.constant 0 : index
    %8 = vector.load %arg8[%c0_6, %c0_7] : memref<8x128xf32, #tpu.memory_space<vmem>>, vector<8x128xf32>
    tpu.vector_store %arg8[%c0_6, %c0_7], %7 {strides = array<i32>} : memref<8x128xf32, #tpu.memory_space<vmem>>, vector<8x128xf32>,
    %c0_i32_8 = arith.constant 0 : i32
    %9 = arith.cmpi eq, %arg1, %c0_i32_8 : i32
    %10 = arith.extui %9 : i1 to i32
    %c0_i32_9 = arith.constant 0 : i32
    %11 = arith.cmpi ne, %10, %c0_i32_9 : i32
    scf.if %11 {
      %c0_10 = arith.constant 0 : index
      %c0_11 = arith.constant 0 : index
      %12 = vector.load %arg8[%c0_10, %c0_11] : memref<8x128xf32, #tpu.memory_space<vmem>>, vector<8x128xf32>
      %c0_12 = arith.constant 0 : index
      %c0_13 = arith.constant 0 : index
      %13 = vector.load %arg4[%c0_12, %c0_13] : memref<1x128xf32, #tpu.memory_space<vmem>>, vector<1x128xf32>
      %14 = vector.broadcast %13 : vector<1x128xf32> to vector<8x128xf32>
      %15 = arith.addf %12, %14 : vector<8x128xf32>
      %cst_14 = arith.constant 0.000000e+00 : f32
      %16 = vector.broadcast %cst_14 : f32 to vector<8x128xf32>
      %17 = arith.maximumf %15, %16 : vector<8x128xf32>
      %18 = arith.truncf %17 : vector<8x128xf32> to vector<8x128xbf16>
      %c0_15 = arith.constant 0 : index
      %c0_16 = arith.constant 0 : index
      %19 = vector.load %arg5[%c0_15, %c0_16] : memref<128x128xbf16, #tpu.memory_space<vmem>>, vector<128x128xbf16>
      %cst_17 = arith.constant dense<0.000000e+00> : vector<8x128xf32>
      %20 = tpu.matmul %18, %19, %cst_17 {dimension_numbers = #tpu.dot_dimension_numbers<[1], [0], [0], [1], [0, 0, 1, 1], [], []>} : vector<8x128xbf16>, vector<128x128xbf16>, vector<8x128xf32> -> vector<8x128xf32>
      %c0_18 = arith.constant 0 : index
      %c0_19 = arith.constant 0 : index
      %21 = vector.load %arg6[%c0_18, %c0_19] : memref<1x128xf32, #tpu.memory_space<vmem>>, vector<1x128xf32>
      %22 = vector.broadcast %21 : vector<1x128xf32> to vector<8x128xf32>
      %23 = arith.addf %20, %22 : vector<8x128xf32>
      %c0_20 = arith.constant 0 : index
      %c0_21 = arith.constant 0 : index
      %24 = vector.load %arg7[%c0_20, %c0_21] : memref<8x128xf32, #tpu.memory_space<vmem>>, vector<8x128xf32>
      tpu.vector_store %arg7[%c0_20, %c0_21], %23 {strides = array<i32>} : memref<8x128xf32, #tpu.memory_space<vmem>>, vector<8x128xf32>,
    } else {
    }
    return
  }
  func.func @transform_0(%arg0: i32, %arg1: i32) -> (i32, i32) {
    %c0_i32 = arith.constant 0 : i32
    return %arg0, %arg1 : i32, i32
  }
  func.func @transform_1(%arg0: i32, %arg1: i32) -> (i32, i32) {
    %c0_i32 = arith.constant 0 : i32
    %c0_i32_0 = arith.constant 0 : i32
    return %arg1, %c0_i32 : i32, i32
  }
  func.func @transform_2(%arg0: i32, %arg1: i32) -> (i32, i32) {
    %c0_i32 = arith.constant 0 : i32
    %c0_i32_0 = arith.constant 0 : i32
    %c0_i32_1 = arith.constant 0 : i32
    return %c0_i32, %c0_i32_0 : i32, i32
  }
  func.func @transform_3(%arg0: i32, %arg1: i32) -> (i32, i32) {
    %c0_i32 = arith.constant 0 : i32
    %c0_i32_0 = arith.constant 0 : i32
    %c0_i32_1 = arith.constant 0 : i32
    return %c0_i32, %c0_i32_0 : i32, i32
  }
  func.func @transform_4(%arg0: i32, %arg1: i32) -> (i32, i32) {
    %c0_i32 = arith.constant 0 : i32
    %c0_i32_0 = arith.constant 0 : i32
    %c0_i32_1 = arith.constant 0 : i32
    return %c0_i32, %c0_i32_0 : i32, i32
  }
  func.func @transform_5(%arg0: i32, %arg1: i32) -> (i32, i32) {
    %c0_i32 = arith.constant 0 : i32
    %c0_i32_0 = arith.constant 0 : i32
    return %arg0, %c0_i32 : i32, i32
  }
}

</mosaic_0001>

<bundles_post_ra>
// kernel: tpu_custom_call.1
= control target key start
LH: loop header
LB: loop body
LE: loop exit
PB: predicated region body
PF: predicated region fallthrough
CT: control target
= control target key end

     0   :  { %10 = vsyncpa [#allocation4], 0  ;;  %s1480_s0 = inlined_call_operand.hbm [shape: bf16[8,1024], index: 0, kind: input, shape index: {}]   ;;  %s1481_s1 = inlined_call_operand.hbm [shape: bf16[1024,128], index: 1, kind: input, shape index: {}]   ;;  %s1482_s2 = inlined_call_operand.hbm [shape: f32[1,128], index: 2, kind: input, shape index: {}]   ;;  %s1483_s3 = inlined_call_operand.hbm [shape: bf16[128,128], index: 3, kind: input, shape index: {}]   ;;  %s1484_s4 = inlined_call_operand.hbm [shape: f32[1,128], index: 4, kind: input, shape index: {}]   ;;  %s1485_s5 = inlined_call_operand.hbm [shape: f32[8,128], index: 5, kind: output, shape index: {}]  }
   0x1   :  { %11 = vsyncpa [#allocation7], 0 }
   0x2   :  { %12 = vsyncpa [#allocation10], 0 }
   0x3   :  { %13 = vsyncpa [#allocation5], 0  ;;  %s1368_s18 = smov [#allocation6]   ;;  %s1228_s22 = scalar_lea.hbm %s1481_s1, 8192 }
   0x4   :  { %s29_s19 = sshll.u32 %s1368_s18, 4  ;;  %p1229_p0 = scmp.ne.s32.totalorder %s1481_s1, %s1228_s22  ;;  %s30_s19 = int_to_ptr.vmem [resolvable:$true] %s29_s19 }
   0x5   :  { %p1232_p1 = scmp.lt.u32.totalorder %s1228_s22, %s1481_s1 }
   0x7   :  { %p1234_p2 = pnand %p1232_p1, %p1229_p0 }
   0x9   :  { %1237 = shalt.err (!%p1234_p2)
}
   0xa   :  { %s1238_s27 = scalar_lea.vmem %s30_s19, 8192  ;;  %p1243_p4 = scmp.lt.s32.totalorder %s30_s19, %s30_s19 }
   0xb   :  { %p1239_p3 = scmp.ne.s32.totalorder %s30_s19, %s1238_s27  ;;  %p1244_p5 = scmp.lt.s32.totalorder %s1238_s27, %s1238_s27 }
   0xd   :  { %p1245_p6 = por %p1244_p5, %p1243_p4 }
   0xf   :  { %p1246_p7 = pnand %p1245_p6, %p1239_p3 }
  0x11   :  { %1249 = shalt.err (!%p1246_p7)
}
  0x12   :  { %s1369_s28 = smov 64   ;;  %s1370_s29 = smov 4  }
  0x13   :  { %35 = dma.hbm_to_vmem [thread:$0]  %s1481_s1, 8192, %s30_s19, [#allocation7], %s1369_s28, %s1369_s28, %s1370_s29  }
  0x14   :  { %s1371_s7 = smov [#allocation9]   ;;  %s1372_s9 = smov [#allocation3]  }
  0x15   :  { %s51_s8 = sshll.u32 %s1371_s7, 4  ;;  %s20_s10 = sshll.u32 %s1372_s9, 4  ;;  %s52_s8 = int_to_ptr.vmem [resolvable:$true] %s51_s8  ;;  %s21_s10 = int_to_ptr.vmem [resolvable:$true] %s20_s10 }
  0x16   :  { %s1250_s13 = scalar_lea.hbm %s1483_s3, 1024 }
  0x17   :  { %p1251_p8 = scmp.ne.s32.totalorder %s1483_s3, %s1250_s13  ;;  %p1254_p9 = scmp.lt.u32.totalorder %s1250_s13, %s1483_s3 }
  0x19   :  { %p1256_p10 = pnand %p1254_p9, %p1251_p8 }
  0x1b   :  { %1259 = shalt.err (!%p1256_p10)
}
  0x1c   :  { %s1260_s1 = scalar_lea.vmem %s52_s8, 1024  ;;  %p1265_p12 = scmp.lt.s32.totalorder %s52_s8, %s52_s8 }
  0x1d   :  { %p1261_p11 = scmp.ne.s32.totalorder %s52_s8, %s1260_s1  ;;  %p1266_p13 = scmp.lt.s32.totalorder %s1260_s1, %s1260_s1 }
  0x1f   :  { %p1267_p0 = por %p1266_p13, %p1265_p12 }
  0x21   :  { %p1268_p1 = pnand %p1267_p0, %p1261_p11 }
  0x23   :  { %1271 = shalt.err (!%p1268_p1)
}
  0x24   :  { %57 = dma.hbm_to_vmem [thread:$0]  %s1483_s3, 1024, %s52_s8, [#allocation10], %s1369_s28, %s1369_s28, %s1370_s29  }
  0x25   :  { %s1272_s22 = scalar_lea.hbm %s1480_s0, 512 }
  0x26   :  { %p1273_p2 = scmp.ne.s32.totalorder %s1480_s0, %s1272_s22  ;;  %p1276_p3 = scmp.lt.u32.totalorder %s1272_s22, %s1480_s0 }
  0x28   :  { %p1278_p4 = pnand %p1276_p3, %p1273_p2 }
  0x2a   :  { %1281 = shalt.err (!%p1278_p4)
}
  0x2b   :  { %s1282_s27 = scalar_lea.vmem %s21_s10, 512  ;;  %p1287_p6 = scmp.lt.s32.totalorder %s21_s10, %s21_s10 }
  0x2c   :  { %p1283_p5 = scmp.ne.s32.totalorder %s21_s10, %s1282_s27  ;;  %p1288_p7 = scmp.lt.s32.totalorder %s1282_s27, %s1282_s27 }
  0x2e   :  { %p1289_p8 = por %p1288_p7, %p1287_p6 }
  0x30   :  { %p1290_p9 = pnand %p1289_p8, %p1283_p5 }
  0x32   :  { %1293 = shalt.err (!%p1290_p9)
}
  0x33   :  { %23 = dma.hbm_to_vmem [thread:$0]  %s1480_s0, 512, %s21_s10, [#allocation4]  }
  0x34   :  { %s1373_s29 = smov [#allocation8]   ;;  %s1374_s6 = smov [#allocation11]  }
  0x35   :  { %s42_s30 = sshll.u32 %s1373_s29, 4  ;;  %s64_s7 = sshll.u32 %s1374_s6, 4  ;;  %s43_s30 = int_to_ptr.vmem [resolvable:$true] %s42_s30  ;;  %s65_s7 = int_to_ptr.vmem [resolvable:$true] %s64_s7 }
  0x36   :  { %s1294_s11 = scalar_lea.hbm %s1482_s2, 16 }
  0x37   :  { %p1295_p10 = scmp.ne.s32.totalorder %s1482_s2, %s1294_s11  ;;  %p1298_p11 = scmp.lt.u32.totalorder %s1294_s11, %s1482_s2 }
  0x39   :  { %p1300_p12 = pnand %p1298_p11, %p1295_p10 }
  0x3b   :  { %1303 = shalt.err (!%p1300_p12)
}
  0x3c   :  { %s1304_s0 = scalar_lea.vmem %s43_s30, 16  ;;  %s1308_s10 = scalar_lea.vmem %s43_s30, 32 }
  0x3d   :  { %p1305_p13 = scmp.ne.s32.totalorder %s43_s30, %s1304_s0  ;;  %p1309_p0 = scmp.lt.s32.totalorder %s43_s30, %s43_s30 }
  0x3e   :  { %p1310_p1 = scmp.lt.s32.totalorder %s1308_s10, %s1304_s0 }
  0x40   :  { %p1311_p2 = por %p1310_p1, %p1309_p0 }
  0x42   :  { %p1312_p3 = pnand %p1311_p2, %p1305_p13 }
  0x44   :  { %1315 = shalt.err (!%p1312_p3)
}
  0x45   :  { %45 = dma.hbm_to_vmem [thread:$0]  %s1482_s2, 16, %s43_s30, [#allocation7]  }
  0x46   :  { %s1316_s19 = scalar_lea.hbm %s1484_s4, 16 }
  0x47   :  { %p1317_p4 = scmp.ne.s32.totalorder %s1484_s4, %s1316_s19  ;;  %p1320_p5 = scmp.lt.u32.totalorder %s1316_s19, %s1484_s4 }
  0x49   :  { %p1322_p6 = pnand %p1320_p5, %p1317_p4 }
  0x4b   :  { %1325 = shalt.err (!%p1322_p6)
}
  0x4c   :  { %s1326_s24 = scalar_lea.vmem %s65_s7, 16  ;;  %s1330_s25 = scalar_lea.vmem %s65_s7, 32 }
  0x4d   :  { %p1327_p7 = scmp.ne.s32.totalorder %s65_s7, %s1326_s24  ;;  %p1331_p8 = scmp.lt.s32.totalorder %s65_s7, %s65_s7 }
  0x4e   :  { %p1332_p9 = scmp.lt.s32.totalorder %s1330_s25, %s1326_s24 }
  0x50   :  { %p1333_p10 = por %p1332_p9, %p1331_p8 }
  0x52   :  { %p1334_p11 = pnand %p1333_p10, %p1327_p7 }
  0x54   :  { %1337 = shalt.err (!%p1334_p11)
}
  0x55   :  { %67 = dma.hbm_to_vmem [thread:$0]  %s1484_s4, 16, %s65_s7, [#allocation10]  }
  0x56   :  { %1360 = dma.done.wait [#allocation4], 512  }
  0x57   :  { %1361 = vsyncadd [#allocation4], 4294966784 }
  0x58   :  { %1362 = dma.done.wait [#allocation7], 8208  }
  0x59   :  { %1363 = vsyncadd [#allocation7], 4294959088 }
  0x5a   :  { %1364 = dma.done.wait [#allocation10], 1040  }
  0x5b   :  { %1365 = vsyncadd [#allocation10], 4294966256  ;;  %v1148_v0 = vld [vmem:[#allocation6 + $0x40] sm:$0xff]   ;;  %v1152_v4 = vld [vmem:[#allocation6 + $0x48] sm:$0xff]   ;;  %vm1376_vm0 = vmmov 0   ;;  %s1377_s4 = smov [#allocation12]  }
  0x5c   :  { %v1149_v1 = vld [vmem:[#allocation6 + $0xc0] sm:$0xff]   ;;  %1021 = vmatprep.subr.bf16.mxu0 %v1148_v0  ;;  %v1153_v5 = vld [vmem:[#allocation6 + $0xc8] sm:$0xff]   ;;  %v1156_v8 = vld [vmem:[#allocation6 + $0x50] sm:$0xff]   ;;  %s928_s27 = sshll.u32 %s1377_s4, 4  ;;  %s929_s27 = int_to_ptr.vmem [resolvable:$true] %s928_s27 }
  0x5d   :  { %v1150_v2 = vld [vmem:[#allocation6] sm:$0xff]   ;;  %1043 = vmatprep.subr.bf16.mxu1 %v1149_v1  ;;  %v1154_v6 = vld [vmem:[#allocation6 + $0x8] sm:$0xff]   ;;  %v1157_v9 = vld [vmem:[#allocation6 + $0xd0] sm:$0xff]   ;;  %s1338_s3 = scalar_lea.vmem %s929_s27, 128  ;;  %p1343_p13 = scmp.lt.s32.totalorder %s929_s27, %s929_s27 }
  0x5e   :  { %v1151_v3 = vld [vmem:[#allocation6 + $0x80] sm:$0xff]   ;;  %1022 = vmatpush3.bf16.msra.mxu0 %v1150_v2  ;;  %v1155_v7 = vld [vmem:[#allocation6 + $0x88] sm:$0xff]   ;;  %v1158_v10 = vld [vmem:[#allocation6 + $0x10] sm:$0xff]   ;;  %p1339_p12 = scmp.ne.s32.totalorder %s929_s27, %s1338_s3  ;;  %p1344_p0 = scmp.lt.s32.totalorder %s1338_s3, %s1338_s3 }
  0x5f   :  { %1044 = vmatpush3.bf16.msra.mxu1 %v1151_v3  ;;  %1023 = vmatprep.subr.bf16.mxu0 %v1152_v4  ;;  %v1159_v11 = vld [vmem:[#allocation6 + $0x90] sm:$0xff]   ;;  %v1160_v12 = vld [vmem:[#allocation6 + $0x58] sm:$0xff]   ;;  %v1164_v16 = vld [vmem:[#allocation6 + $0x60] sm:$0xff]  }
  0x60   :  { %1045 = vmatprep.subr.bf16.mxu1 %v1153_v5  ;;  %v1161_v13 = vld [vmem:[#allocation6 + $0xd8] sm:$0xff]   ;;  %v1165_v17 = vld [vmem:[#allocation6 + $0xe0] sm:$0xff]   ;;  %v1168_v20 = vld [vmem:[#allocation6 + $0x68] sm:$0xff]   ;;  %p1345_p1 = por %p1344_p0, %p1343_p13 }
  0x61   :  { %v1162_v14 = vld [vmem:[#allocation6 + $0x18] sm:$0xff]   ;;  %v1166_v18 = vld [vmem:[#allocation6 + $0x20] sm:$0xff]   ;;  %v1169_v21 = vld [vmem:[#allocation6 + $0xe8] sm:$0xff]  }
  0x62   :  { %1024 = vmatpush3.bf16.msra.mxu0 %v1154_v6  ;;  %v1163_v15 = vld [vmem:[#allocation6 + $0x98] sm:$0xff]   ;;  %v1167_v19 = vld [vmem:[#allocation6 + $0xa0] sm:$0xff]   ;;  %v1170_v22 = vld [vmem:[#allocation6 + $0x28] sm:$0xff]   ;;  %p1346_p2 = pnand %p1345_p1, %p1339_p12 }
  0x63   :  { %1046 = vmatpush3.bf16.msra.mxu1 %v1155_v7  ;;  %1025 = vmatprep.subr.bf16.mxu0 %v1156_v8  ;;  %v1171_v23 = vld [vmem:[#allocation6 + $0xa8] sm:$0xff]   ;;  %v1172_v24 = vld [vmem:[#allocation6 + $0x70] sm:$0xff]   ;;  %v1176_v28 = vld [vmem:[#allocation6 + $0x78] sm:$0xff]  }
  0x64   :  { %1047 = vmatprep.subr.bf16.mxu1 %v1157_v9  ;;  %v1173_v25 = vld [vmem:[#allocation6 + $0xf0] sm:$0xff]   ;;  %v1177_v29 = vld [vmem:[#allocation6 + $0xf8] sm:$0xff]   ;;  %v90_v32 = vld [vmem:[#allocation3] sm:$0xff] }
  0x65   :  { %v1174_v26 = vld [vmem:[#allocation6 + $0x30] sm:$0xff]   ;;  %v1178_v30 = vld [vmem:[#allocation6 + $0x38] sm:$0xff]   ;;  %v91_v33 = vld [vmem:[#allocation3 + $0x8] sm:$0xff]  ;;  %v939_v34 = vcombine.low %v90_v32, %v90_v32  ;;  %v940_v35 = vcombine.high %v90_v32, %v90_v32 }
  0x66   :  { %1026 = vmatpush3.bf16.msra.mxu0 %v1158_v10  ;;  %v1175_v27 = vld [vmem:[#allocation6 + $0xb0] sm:$0xff]   ;;  %v1179_v31 = vld [vmem:[#allocation6 + $0xb8] sm:$0xff]   ;;  %v941_v36 = vcombine.low %v91_v33, %v91_v33  ;;  %v942_v37 = vcombine.high %v91_v33, %v91_v33  ;;  %v1184_v38 = vld [vmem:[#allocation6 + $0x140] sm:$0xff]  }
  0x67   :  { %1048 = vmatpush3.bf16.msra.mxu1 %v1159_v11  ;;  %1027 = vmatprep.subr.bf16.mxu0 %v1160_v12  ;;  %v1185_v39 = vld [vmem:[#allocation6 + $0x1c0] sm:$0xff]   ;;  %v1188_v42 = vld [vmem:[#allocation6 + $0x148] sm:$0xff]   ;;  %v1192_v46 = vld [vmem:[#allocation6 + $0x150] sm:$0xff]  }
  0x68   :  { %1049 = vmatprep.subr.bf16.mxu1 %v1161_v13  ;;  %666 = vmatprep.mubr.bf16.mxu0 %v940_v35  ;;  %v1186_v40 = vld [vmem:[#allocation6 + $0x100] sm:$0xff]   ;;  %v1189_v43 = vld [vmem:[#allocation6 + $0x1c8] sm:$0xff]   ;;  %v1193_v47 = vld [vmem:[#allocation6 + $0x1d0] sm:$0xff]   ;;  %v1375_v13 = vmov 0.0  }
  0x69   :  { %706 = vmatprep.mubr.bf16.mxu1 %v942_v37  ;;  %v1187_v41 = vld [vmem:[#allocation6 + $0x180] sm:$0xff]   ;;  %v1190_v44 = vld [vmem:[#allocation6 + $0x108] sm:$0xff]   ;;  %v1194_v48 = vld [vmem:[#allocation6 + $0x110] sm:$0xff]  }
  0x6a   :  { %1028 = vmatpush3.bf16.msra.mxu0 %v1162_v14  ;;  %v1191_v45 = vld [vmem:[#allocation6 + $0x188] sm:$0xff]   ;;  %v1195_v49 = vld [vmem:[#allocation6 + $0x190] sm:$0xff]   ;;  %v1196_v50 = vld [vmem:[#allocation6 + $0x158] sm:$0xff]  }
  0x6b   :  { %1050 = vmatpush3.bf16.msra.mxu1 %v1163_v15  ;;  %1029 = vmatprep.subr.bf16.mxu0 %v1164_v16  ;;  %v1197_v51 = vld [vmem:[#allocation6 + $0x1d8] sm:$0xff]   ;;  %v1200_v54 = vld [vmem:[#allocation6 + $0x160] sm:$0xff]   ;;  %v1204_v58 = vld [vmem:[#allocation6 + $0x168] sm:$0xff]  }
  0x6c   :  { %1051 = vmatprep.subr.bf16.mxu1 %v1165_v17  ;;  %v1198_v52 = vld [vmem:[#allocation6 + $0x118] sm:$0xff]   ;;  %v1201_v55 = vld [vmem:[#allocation6 + $0x1e0] sm:$0xff]   ;;  %v1205_v59 = vld [vmem:[#allocation6 + $0x1e8] sm:$0xff]  }
  0x6d   :  { %v1199_v53 = vld [vmem:[#allocation6 + $0x198] sm:$0xff]   ;;  %v1202_v56 = vld [vmem:[#allocation6 + $0x120] sm:$0xff]   ;;  %v1206_v60 = vld [vmem:[#allocation6 + $0x128] sm:$0xff]  }
  0x6e   :  { %1030 = vmatpush3.bf16.msra.mxu0 %v1166_v18  ;;  %v1203_v57 = vld [vmem:[#allocation6 + $0x1a0] sm:$0xff]   ;;  %v1207_v61 = vld [vmem:[#allocation6 + $0x1a8] sm:$0xff]   ;;  %v1208_v62 = vld [vmem:[#allocation6 + $0x170] sm:$0xff]  }
  0x6f   :  { %1052 = vmatpush3.bf16.msra.mxu1 %v1167_v19  ;;  %1031 = vmatprep.subr.bf16.mxu0 %v1168_v20  ;;  %v1209_v63 = vld [vmem:[#allocation6 + $0x1f0] sm:$0xff]   ;;  %v1212_v2 = vld [vmem:[#allocation6 + $0x178] sm:$0xff]   ;;  %v1220_v12 = vld [vmem:[#allocation9] sm:$0xff]  }
  0x70   :  { %1053 = vmatprep.subr.bf16.mxu1 %v1169_v21  ;;  %v1210_v0 = vld [vmem:[#allocation6 + $0x130] sm:$0xff]   ;;  %v1213_v3 = vld [vmem:[#allocation6 + $0x1f8] sm:$0xff]   ;;  %v1224_v17 = vld [vmem:[#allocation9 + $0x20] sm:$0xff]  }
  0x71   :  { %v1211_v1 = vld [vmem:[#allocation6 + $0x1b0] sm:$0xff]   ;;  %v1214_v4 = vld [vmem:[#allocation6 + $0x138] sm:$0xff]  }
  0x72   :  { %1032 = vmatpush3.bf16.msra.mxu0 %v1170_v22  ;;  %v1215_v5 = vld [vmem:[#allocation6 + $0x1b8] sm:$0xff]   ;;  %v92_v6 = vld [vmem:[#allocation3 + $0x10] sm:$0xff] }
  0x73   :  { %1054 = vmatpush3.bf16.msra.mxu1 %v1171_v23  ;;  %1033 = vmatprep.subr.bf16.mxu0 %v1172_v24  ;;  %v943_v7 = vcombine.low %v92_v6, %v92_v6  ;;  %v944_v8 = vcombine.high %v92_v6, %v92_v6  ;;  %v93_v9 = vld [vmem:[#allocation3 + $0x18] sm:$0xff]  ;;  %v1221_v14 = vld [vmem:[#allocation9 + $0x8] sm:$0xff]  }
  0x74   :  { %1055 = vmatprep.subr.bf16.mxu1 %v1173_v25  ;;  %v945_v10 = vcombine.low %v93_v9, %v93_v9  ;;  %v946_v11 = vcombine.high %v93_v9, %v93_v9  ;;  %v1222_v15 = vld [vmem:[#allocation9 + $0x10] sm:$0xff]   ;;  %v1223_v16 = vld [vmem:[#allocation9 + $0x18] sm:$0xff]   ;;  %v1225_v18 = vld [vmem:[#allocation9 + $0x28] sm:$0xff]  }
  0x75   :  { %v1226_v19 = vld [vmem:[#allocation9 + $0x30] sm:$0xff]   ;;  %v1227_v20 = vld [vmem:[#allocation9 + $0x38] sm:$0xff]  }
  0x76   :  { %1034 = vmatpush3.bf16.msra.mxu0 %v1174_v26 }
  0x77   :  { %1056 = vmatpush3.bf16.msra.mxu1 %v1175_v27  ;;  %1035 = vmatprep.subr.bf16.mxu0 %v1176_v28 }
  0x78   :  { %1057 = vmatprep.subr.bf16.mxu1 %v1177_v29 }
  0x7a   :  { %1036 = vmatpush3.bf16.msra.mxu0 %v1178_v30 }
  0x7b   :  { %1058 = vmatpush3.bf16.msra.mxu1 %v1179_v31  ;;  %1065 = vmatprep.subr.bf16.mxu0 %v1184_v38 }
  0x7c   :  { %1087 = vmatprep.subr.bf16.mxu1 %v1185_v39 }
  0x7d   :  { %667 = vmatmul.mubr.bf16.vlgmr.msra.gmra.mrb[0].mxu0 %v939_v34 }
  0x7e   :  { %707 = vmatmul.mubr.bf16.vlgmr.msra.gmra.mrb[0].mxu1 %v941_v36  ;;  %1066 = vmatpush3.bf16.msra.mxu0 %v1186_v40 }
  0x7f   :  { %1088 = vmatpush3.bf16.msra.mxu1 %v1187_v41  ;;  %1067 = vmatprep.subr.bf16.mxu0 %v1188_v42 }
  0x80   :  { %1089 = vmatprep.subr.bf16.mxu1 %v1189_v43  ;;  %746 = vmatprep.mubr.bf16.mxu0 %v944_v8  ;;  %v1011_v43 = vld [vmem:[#allocation8] ss:$0 sm:$0xff] }
  0x81   :  { %786 = vmatprep.mubr.bf16.mxu1 %v946_v11 }
  0x82   :  { %1068 = vmatpush3.bf16.msra.mxu0 %v1190_v44 }
  0x83   :  { %1090 = vmatpush3.bf16.msra.mxu1 %v1191_v45  ;;  %1069 = vmatprep.subr.bf16.mxu0 %v1192_v46 }
  0x84   :  { %1091 = vmatprep.subr.bf16.mxu1 %v1193_v47 }
  0x86   :  { %1070 = vmatpush3.bf16.msra.mxu0 %v1194_v48  ;;  %v1012_v48 = vld [vmem:[#allocation11] ss:$0 sm:$0xff] }
  0x87   :  { %1092 = vmatpush3.bf16.msra.mxu1 %v1195_v49  ;;  %1071 = vmatprep.subr.bf16.mxu0 %v1196_v50 }
  0x88   :  { %1093 = vmatprep.subr.bf16.mxu1 %v1197_v51 }
  0x8a   :  { %1072 = vmatpush3.bf16.msra.mxu0 %v1198_v52 }
  0x8b   :  { %1094 = vmatpush3.bf16.msra.mxu1 %v1199_v53  ;;  %1073 = vmatprep.subr.bf16.mxu0 %v1200_v54 }
  0x8c   :  { %1095 = vmatprep.subr.bf16.mxu1 %v1201_v55 }
  0x8e   :  { %1074 = vmatpush3.bf16.msra.mxu0 %v1202_v56 }
  0x8f   :  { %1096 = vmatpush3.bf16.msra.mxu1 %v1203_v57  ;;  %1075 = vmatprep.subr.bf16.mxu0 %v1204_v58 }
  0x90   :  { %1097 = vmatprep.subr.bf16.mxu1 %v1205_v59 }
  0x92   :  { %1076 = vmatpush3.bf16.msra.mxu0 %v1206_v60 }
  0x93   :  { %1098 = vmatpush3.bf16.msra.mxu1 %v1207_v61  ;;  %1077 = vmatprep.subr.bf16.mxu0 %v1208_v62 }
  0x94   :  { %1099 = vmatprep.subr.bf16.mxu1 %v1209_v63 }
  0x96   :  { %1078 = vmatpush3.bf16.msra.mxu0 %v1210_v0 }
  0x97   :  { %1100 = vmatpush3.bf16.msra.mxu1 %v1211_v1  ;;  %1079 = vmatprep.subr.bf16.mxu0 %v1212_v2 }
  0x98   :  { %1101 = vmatprep.subr.bf16.mxu1 %v1213_v3 }
  0x9a   :  { %1080 = vmatpush3.bf16.msra.mxu0 %v1214_v4 }
  0x9b   :  { %1102 = vmatpush3.bf16.msra.mxu1 %v1215_v5  ;;  %1118 = vmatprep.subr.bf16.mxu0 %v1375_v13 }
  0x9d   :  { %747 = vmatmul.mubr.bf16.vlgmr.msra.gmra.mrb[4].mxu0 %v943_v7 }
  0x9e   :  { %787 = vmatmul.mubr.bf16.vlgmr.msra.gmra.mrb[4].mxu1 %v945_v10  ;;  %1119 = vmatpush3.bf16.msra.mxu0 %v1220_v12 }
  0x9f   :  { %1120 = vmatprep.subr.bf16.mxu0 %v1375_v13  ;;  %1134 = vmatprep.mubr.msk.bf16.mxu0 %vm1376_vm0, %v1375_v13 }
  0xa2   :  { %1121 = vmatpush3.bf16.msra.mxu0 %v1221_v14 }
  0xa3   :  { %1122 = vmatprep.subr.bf16.mxu0 %v1375_v13 }
  0xa6   :  { %1123 = vmatpush3.bf16.msra.mxu0 %v1222_v15 }
  0xa7   :  { %1124 = vmatprep.subr.bf16.mxu0 %v1375_v13 }
  0xaa   :  { %1125 = vmatpush3.bf16.msra.mxu0 %v1223_v16 }
  0xab   :  { %1126 = vmatprep.subr.bf16.mxu0 %v1375_v13 }
  0xae   :  { %1127 = vmatpush3.bf16.msra.mxu0 %v1224_v17 }
  0xaf   :  { %1128 = vmatprep.subr.bf16.mxu0 %v1375_v13 }
  0xb2   :  { %1129 = vmatpush3.bf16.msra.mxu0 %v1225_v18 }
  0xb3   :  { %1130 = vmatprep.subr.bf16.mxu0 %v1375_v13 }
  0xb6   :  { %1131 = vmatpush3.bf16.msra.mxu0 %v1226_v19 }
  0xb7   :  { %1132 = vmatprep.subr.bf16.mxu0 %v1375_v13 }
  0xba   :  { %1133 = vmatpush3.bf16.msra.mxu0 %v1227_v20 }
 0x150   :  { %v1037_v21 = vpop.f32.mrb[0].mxu0 }
 0x151   :  { %v1059_v22 = vpop.f32.mrb[0].mxu1  ;;  %v1038_v23 = vpop.f32.mrb[1].mxu0 }
 0x152   :  { %v1060_v24 = vpop.f32.mrb[1].mxu1  ;;  %v1039_v25 = vadd.f32 %v1038_v23, %v1037_v21  ;;  %v1040_v27 = vpop.f32.mrb[2].mxu0 }
 0x153   :  { %v1061_v26 = vadd.f32 %v1060_v24, %v1059_v22  ;;  %v1062_v28 = vpop.f32.mrb[2].mxu1  ;;  %v1041_v29 = vpop.f32.mrb[3].mxu0 }
 0x154   :  { %v1063_v30 = vpop.f32.mrb[3].mxu1 }
 0x155   :  { %v709_v31 = vadd.f32 %v1061_v26, %v1039_v25 }
 0x170   :  { %v1081_v32 = vpop.f32.mrb[4].mxu0 }
 0x171   :  { %v1103_v33 = vpop.f32.mrb[4].mxu1  ;;  %v1082_v34 = vpop.f32.mrb[5].mxu0 }
 0x172   :  { %v1104_v35 = vpop.f32.mrb[5].mxu1  ;;  %v1083_v36 = vadd.f32 %v1082_v34, %v1081_v32  ;;  %v1084_v38 = vpop.f32.mrb[6].mxu0 }
 0x173   :  { %v1105_v37 = vadd.f32 %v1104_v35, %v1103_v33  ;;  %v1106_v39 = vpop.f32.mrb[6].mxu1  ;;  %v1085_v40 = vpop.f32.mrb[7].mxu0 }
 0x174   :  { %v1107_v41 = vpop.f32.mrb[7].mxu1  ;;  %v749_v42 = vadd.f32 %v1083_v36, %v709_v31 }
 0x176   :  { %v789_v44 = vadd.f32 %v1105_v37, %v749_v42 }
 0x178   :  { %v807_v45 = vadd.f32 %v1011_v43, %v789_v44 }
 0x17a   :  { %v808_v46 = vmax.f32 %v807_v45, 0.0 }
 0x17c   :  { %v809_v47 = vpack.c.bf16 %v808_v46, %v808_v46 }
 0x17e   :  { %1135 = vmatmul.mubr.bf16.vlgmr.msra.gmra.mrb[8].mxu0 %v809_v47 }
 0x251   :  { %v915_v49 = vpop.f32.mrb[8].mxu0 }
 0x252   :  { %v916_v50 = vadd.f32 %v1012_v48, %v915_v49  ;;  %v1136_v51 = vpop.f32.mrb[9].mxu0 }
 0x253   :  { %v918_v52 = vpop.f32.mrb[10].mxu0 }
 0x254   :  { %921 = vst [vmem:[#allocation12] sm:$0xff] %v916_v50  ;;  %v1137_v53 = vpop.f32.mrb[11].mxu0 }
 0x255   :  { %1349 = shalt.err (!%p1346_p2)
}
 0x256   :  { %s1350_s30 = scalar_lea.hbm %s1485_s5, 128 }
 0x257   :  { %p1351_p3 = scmp.ne.s32.totalorder %s1485_s5, %s1350_s30  ;;  %p1354_p4 = scmp.lt.u32.totalorder %s1350_s30, %s1485_s5 }
 0x259   :  { %p1356_p5 = pnand %p1354_p4, %p1351_p3 }
 0x25b   :  { %1359 = shalt.err (!%p1356_p5)
}
 0x25c   :  { %931 = dma.vmem_to_hbm [thread:$0]  %s929_s27, 128, %s1485_s5, [#allocation5]  }
 0x25d   :  { %1366 = dma.done.wait [#allocation5], 128  }
 0x25e   :  { %1367 = vsyncadd [#allocation5], 4294967168 }
 0x25f   :  { %935 = vsyncpa [#allocation4], 1 }
 0x260   :  { %936 = vsyncpa [#allocation7], 1 }
 0x261   :  { %937 = vsyncpa [#allocation10], 1 }
 0x262   :  { %938 = vsyncpa [#allocation5], 1 }

</bundles_post_ra>
